<compile_context>
chip_gen: v5e
topology: v5e:2x2
jax: 0.10.0
libtpu: 0.0.40
codegen_flags: <defaults>
</compile_context>

<pallas_src>
import numpy as np
import jax
import jax.numpy as jnp
from jax.experimental import pallas as pl
from jax.experimental.pallas import tpu as pltpu

_SQRT1_2 = 0.7071067811865476


def _times_block_kernel(x_ref, k_ref, b_ref, o_ref):
    """One grid step: y = GELU(x_slab @ K + bias_row) on a (G, D*T) slab."""
    acc = jnp.dot(x_ref[...], k_ref[...],
                  preferred_element_type=jnp.float32)        # (G, DT) f32
    acc = acc + b_ref[...]                                   # (1, DT) broadcast
    # Exact (erf-based) GELU, matching nn.GELU() default.
    o_ref[...] = (0.5 * acc * (1.0 + jax.lax.erf(acc * _SQRT1_2))).astype(o_ref.dtype)


def _spectral_tap_matrices(T):
    """M_j = shift_j(Re-rfft basis) @ irfft-of-real basis, each (T, T)."""
    F = T // 2 + 1
    t = np.arange(T, dtype=np.float64)[:, None]
    k = np.arange(F, dtype=np.float64)[None, :]
    ang = 2.0 * np.pi * t * k / T
    cfwd = np.cos(ang)                                       # (T, F): Re(rfft)
    wk = np.full((F,), 2.0)
    wk[0] = 1.0
    if T % 2 == 0:
        wk[-1] = 1.0                                         # Nyquist counted once
    cinv = (np.cos(ang) * wk[None, :] / T).T                 # (F, T): irfft of real spec

    # Conv1d tap shifts (zero boundary) folded into the forward basis.
    cfwd_m1 = np.zeros_like(cfwd); cfwd_m1[:, 1:] = cfwd[:, :-1]   # tap uses X[:, f-1]
    cfwd_p1 = np.zeros_like(cfwd); cfwd_p1[:, :-1] = cfwd[:, 1:]   # tap uses X[:, f+1]

    m = np.stack([cfwd_m1 @ cinv, cfwd @ cinv, cfwd_p1 @ cinv])    # (3, T, T)
    colsum = cinv.sum(axis=0)                                # (T,): bias' time profile
    return m, colsum


def _pick_group(BN, DT, vmem_cap, target_rows=512, min_steps=4):
    """Largest divisor G of BN keeping blocks 8-aligned, in VMEM, and pipelined."""
    # Per-row pipelined bytes: 2 bf16 input bufs + 2 f32 output bufs ~= 12*DT.
    cap_rows = max(1, (vmem_cap // 4) // max(12 * DT, 1))
    divisors = [g for g in range(1, BN + 1) if BN % g == 0]
    cands = [g for g in divisors
             if g <= min(target_rows, cap_rows) and (g % 8 == 0 or g == BN)]
    if not cands:
        return BN
    piped = [g for g in cands if BN // g >= min_steps]       # keep DMA/compute overlap
    return max(piped) if piped else max(cands)


def times_block_forward(x, weight, bias, seq_len):
    """x: (B, T, N, D) f32; weight: (D, D, 3) [out, in, tap]; bias: (D,)."""
    B, T, N, D = x.shape
    assert seq_len == T, "reshape back to (B, N, D, T) requires seq_len == T"
    BN = B * N
    DT = D * T

    try:    # generation-aware VMEM sizing (64 MiB on v7x, 128 MiB on v5e/v6e)
        vmem_cap = int(pltpu.get_tpu_info().vmem_capacity_bytes)
    except Exception:
        vmem_cap = 64 << 20
    G = _pick_group(BN, DT, vmem_cap)

    # (B,T,N,D) -> (BN, D*T): each bn-row's (D,T) block flattened, time fastest.
    x2d = jnp.transpose(x, (0, 2, 3, 1)).reshape(BN, DT).astype(jnp.bfloat16)

    # Fused spectral + conv operator: K[(i,t),(o,t')] = sum_j W[o,i,j] * M_j[t,t'].
    m_np, colsum_np = _spectral_tap_matrices(T)
    m = jnp.asarray(m_np, jnp.float32)                       # (3, T, T)
    k_op = jnp.einsum("oij,jtu->itou", weight.astype(jnp.float32), m)
    k_op = k_op.reshape(DT, DT).astype(jnp.bfloat16)         # resident MXU operand

    # Bias folded through the irfft: one (1, D*T) f32 row, broadcast in-kernel.
    colsum = jnp.asarray(colsum_np, jnp.float32)             # (T,)
    bias_row = (bias.astype(jnp.float32)[:, None] * colsum[None, :]).reshape(1, DT)

    # VMEM budget: double-buffered x/out blocks + single-buffered residents.
    est = 2 * G * DT * 2 + 2 * G * DT * 4 + DT * DT * 2 + DT * 4
    vmem_limit = int(min(max(2 * est, 8 << 20), (vmem_cap * 3) // 4))

    out2d = pl.pallas_call(
        _times_block_kernel,
        out_shape=jax.ShapeDtypeStruct((BN, DT), jnp.float32),
        grid_spec=pltpu.PrefetchScalarGridSpec(
            num_scalar_prefetch=0,
            grid=(BN // G,),
            in_specs=[
                pl.BlockSpec((G, DT), lambda i: (i, 0)),            # x slab (pipelined)
                pl.BlockSpec(memory_space=pltpu.MemorySpace.VMEM),  # K (resident)
                pl.BlockSpec(memory_space=pltpu.MemorySpace.VMEM),  # bias row (resident)
            ],
            out_specs=pl.BlockSpec((G, DT), lambda i: (i, 0)),      # no pad columns
        ),
        compiler_params=pltpu.CompilerParams(
            dimension_semantics=("parallel",),
            vmem_limit_bytes=vmem_limit),
    )(x2d, k_op, bias_row)

    # TODO(synk): if the consumer accepts (B, N, D, T), skip this transpose epilogue.
    out = out2d.reshape(B, N, D, T)
    return jnp.transpose(out, (0, 3, 1, 2))                  # (B, T, N, D)


def _reference_forward(x, weight, bias, seq_len):
    """Pure-JAX emulation of the PyTorch module (for correctness check)."""
    B, T, N, D = x.shape
    xp = jnp.transpose(x, (0, 2, 3, 1)).reshape(B * N, D, T)
    xf = jnp.fft.rfft(xp, axis=-1).real
    conv = jax.lax.conv_general_dilated(
        xf, weight, window_strides=(1,), padding=((1, 1),),
        dimension_numbers=("NCH", "OIH", "NCH"))
    conv = conv + bias[None, :, None]
    y = jnp.fft.irfft(conv, n=seq_len, axis=-1)
    y = 0.5 * y * (1.0 + jax.lax.erf(y * _SQRT1_2))
    return jnp.transpose(y.reshape(B, N, D, T), (0, 3, 1, 2))


if __name__ == "__main__":
    B, T, N, D = 2, 16, 4, 8           # small shapes consistent with the module
    seq_len = T                         # forward requires seq_len == T

    key = jax.random.PRNGKey(0)
    kx, kw, kb = jax.random.split(key, 3)
    x = jax.random.normal(kx, (B, T, N, D), dtype=jnp.float32)

    # Deterministic Conv1d params (PyTorch-default-style uniform init).
    fan_in = D * 3
    bound = 1.0 / np.sqrt(fan_in)
    weight = jax.random.uniform(kw, (D, D, 3), jnp.float32, -bound, bound)
    bias = jax.random.uniform(kb, (D,), jnp.float32, -bound, bound)

    out = jax.block_until_ready(times_block_forward(x, weight, bias, seq_len))
    ref = jax.block_until_ready(_reference_forward(x, weight, bias, seq_len))

    assert out.shape == (B, T, N, D), out.shape
    max_err = float(jnp.max(jnp.abs(out - ref)))
    assert max_err < 5e-2, f"max abs err {max_err}"
    print("KERNEL_OK")
</pallas_src>

<mosaic_0001>
module attributes {stable_mosaic.version = 11 : i64} {
  func.func @_times_block_kernel(%arg0: i32, %arg1: memref<8x128xbf16, #tpu.memory_space<vmem>>, %arg2: memref<128x128xbf16, #tpu.memory_space<vmem>>, %arg3: memref<1x128xf32, #tpu.memory_space<vmem>>, %arg4: memref<8x128xf32, #tpu.memory_space<vmem>>) attributes {dimension_semantics = [#tpu.dimension_semantics<parallel>], iteration_bounds = array<i64: 1>, scalar_prefetch = 0 : i64, scratch_operands = 0 : i64, tpu.core_type = #tpu.core_type<tc>, window_params = [{transform_indices = @transform_0, window_bounds = array<i64: 8, 128>}, {pipeline_mode = #tpu.pipeline_mode<synchronous>, transform_indices = @transform_1, window_bounds = array<i64: 128, 128>}, {pipeline_mode = #tpu.pipeline_mode<synchronous>, transform_indices = @transform_2, window_bounds = array<i64: 1, 128>}, {transform_indices = @transform_3, window_bounds = array<i64: 8, 128>}]} {
    %c0 = arith.constant 0 : index
    %c0_0 = arith.constant 0 : index
    %0 = vector.load %arg1[%c0, %c0_0] : memref<8x128xbf16, #tpu.memory_space<vmem>>, vector<8x128xbf16>
    %c0_1 = arith.constant 0 : index
    %c0_2 = arith.constant 0 : index
    %1 = vector.load %arg2[%c0_1, %c0_2] : memref<128x128xbf16, #tpu.memory_space<vmem>>, vector<128x128xbf16>
    %cst = arith.constant dense<0.000000e+00> : vector<8x128xf32>
    %2 = tpu.matmul %0, %1, %cst {dimension_numbers = #tpu.dot_dimension_numbers<[1], [0], [0], [1], [0, 0, 1, 1], [], []>} : vector<8x128xbf16>, vector<128x128xbf16>, vector<8x128xf32> -> vector<8x128xf32>
    %c0_3 = arith.constant 0 : index
    %c0_4 = arith.constant 0 : index
    %3 = vector.load %arg3[%c0_3, %c0_4] : memref<1x128xf32, #tpu.memory_space<vmem>>, vector<1x128xf32>
    %4 = vector.broadcast %3 : vector<1x128xf32> to vector<8x128xf32>
    %5 = arith.addf %2, %4 : vector<8x128xf32>
    %cst_5 = arith.constant 5.000000e-01 : f32
    %6 = vector.broadcast %cst_5 : f32 to vector<8x128xf32>
    %7 = arith.mulf %6, %5 : vector<8x128xf32>
    %cst_6 = arith.constant 0.707106769 : f32
    %8 = vector.broadcast %cst_6 : f32 to vector<8x128xf32>
    %9 = arith.mulf %5, %8 : vector<8x128xf32>
    %10 = math.erf %9 : vector<8x128xf32>
    %cst_7 = arith.constant 1.000000e+00 : f32
    %11 = vector.broadcast %cst_7 : f32 to vector<8x128xf32>
    %12 = arith.addf %11, %10 : vector<8x128xf32>
    %13 = arith.mulf %7, %12 : vector<8x128xf32>
    %c0_8 = arith.constant 0 : index
    %c0_9 = arith.constant 0 : index
    %14 = vector.load %arg4[%c0_8, %c0_9] : memref<8x128xf32, #tpu.memory_space<vmem>>, vector<8x128xf32>
    tpu.vector_store %arg4[%c0_8, %c0_9], %13 {strides = array<i32>} : memref<8x128xf32, #tpu.memory_space<vmem>>, vector<8x128xf32>,
    return
  }
  func.func @transform_0(%arg0: i32) -> (i32, i32) {
    %c0_i32 = arith.constant 0 : i32
    %c0_i32_0 = arith.constant 0 : i32
    return %arg0, %c0_i32 : i32, i32
  }
  func.func @transform_1(%arg0: i32) -> (i32, i32) {
    %c0_i32 = arith.constant 0 : i32
    %c0_i32_0 = arith.constant 0 : i32
    %c0_i32_1 = arith.constant 0 : i32
    return %c0_i32, %c0_i32_0 : i32, i32
  }
  func.func @transform_2(%arg0: i32) -> (i32, i32) {
    %c0_i32 = arith.constant 0 : i32
    %c0_i32_0 = arith.constant 0 : i32
    %c0_i32_1 = arith.constant 0 : i32
    return %c0_i32, %c0_i32_0 : i32, i32
  }
  func.func @transform_3(%arg0: i32) -> (i32, i32) {
    %c0_i32 = arith.constant 0 : i32
    %c0_i32_0 = arith.constant 0 : i32
    return %arg0, %c0_i32 : i32, i32
  }
}

</mosaic_0001>

<bundles_post_ra>
// kernel: tpu_custom_call.1
= control target key start
LH: loop header
LB: loop body
LE: loop exit
PB: predicated region body
PF: predicated region fallthrough
CT: control target
= control target key end

     0   :  { %8 = vsyncpa [#allocation3], 0  ;;  %s354_s0 = inlined_call_operand.hbm [shape: bf16[8,128], index: 0, kind: input, shape index: {}]   ;;  %s355_s1 = inlined_call_operand.hbm [shape: bf16[128,128], index: 1, kind: input, shape index: {}]   ;;  %s356_s2 = inlined_call_operand.vmem [shape: f32[1,128], index: 2, kind: input, shape index: {}]   ;;  %s357_s3 = inlined_call_operand.hbm [shape: f32[8,128], index: 3, kind: output, shape index: {}]  }
   0x1   :  { %9 = vsyncpa [#allocation6], 0 }
   0x2   :  { %10 = vsyncpa [#allocation4], 0  ;;  %s16_s14 = sshll.u32 %s354_s0, 4  ;;  %s317_s15 = smov [#allocation2]   ;;  %s17_s14 = int_to_ptr.hbm [resolvable:$true] %s16_s14 }
   0x3   :  { %s18_s16 = sshll.u32 %s317_s15, 4  ;;  %s26_s19 = sshll.u32 %s355_s1, 4  ;;  %s19_s16 = int_to_ptr.vmem [resolvable:$true] %s18_s16  ;;  %s27_s19 = int_to_ptr.hbm [resolvable:$true] %s26_s19 }
   0x4   :  { %21 = dma.hbm_to_vmem [thread:$0]  %s17_s14, 64, %s19_s16, [#allocation3]  }
   0x5   :  { %s318_s20 = smov [#allocation5]   ;;  %s319_s22 = smov 64  }
   0x6   :  { %s28_s21 = sshll.u32 %s318_s20, 4  ;;  %s320_s23 = smov 4   ;;  %s29_s21 = int_to_ptr.vmem [resolvable:$true] %s28_s21 }
   0x7   :  { %34 = dma.hbm_to_vmem [thread:$0]  %s27_s19, 1024, %s29_s21, [#allocation6], %s319_s22, %s319_s22, %s320_s23  }
   0x8   :  { %311 = dma.done.wait [#allocation3], 64  }
   0x9   :  { %312 = vsyncadd [#allocation3], 4294967232 }
   0xa   :  { %313 = dma.done.wait [#allocation6], 1024  }
   0xb   :  { %314 = vsyncadd [#allocation6], 4294966272  ;;  %v230_v0 = vld [vmem:[#allocation5 + $0x38] sm:$0xff]  ;;  %v229_v1 = vld [vmem:[#allocation5 + $0x30] sm:$0xff]  ;;  %s179_s27 = sshll.u32 %s357_s3, 4  ;;  %s180_s27 = int_to_ptr.hbm [resolvable:$true] %s179_s27 }
   0xc   :  { %114 = vmatpush.bf16.msra.mxu0 %v230_v0  ;;  %v228_v2 = vld [vmem:[#allocation5 + $0x28] sm:$0xff]  ;;  %v227_v3 = vld [vmem:[#allocation5 + $0x20] sm:$0xff]  ;;  %v226_v4 = vld [vmem:[#allocation5 + $0x18] sm:$0xff] }
   0xd   :  { %v225_v5 = vld [vmem:[#allocation5 + $0x10] sm:$0xff]  ;;  %v224_v6 = vld [vmem:[#allocation5 + $0x8] sm:$0xff]  ;;  %v223_v7 = vld [vmem:[#allocation5] sm:$0xff] }
   0xe   :  { %v45_v8 = vld [vmem:[#allocation2] sm:$0xf] }
   0xf   :  { %v236_v9 = vld [vmem:[%s356_s2] ss:$0 sm:$0xff]  ;;  %s321_s2 = smov [#allocation7]  }
  0x10   :  { %115 = vmatpush.bf16.msra.mxu0 %v229_v1  ;;  %s177_s24 = sshll.u32 %s321_s2, 4  ;;  %s178_s24 = int_to_ptr.vmem [resolvable:$true] %s177_s24 }
  0x14   :  { %116 = vmatpush.bf16.msra.mxu0 %v228_v2 }
  0x18   :  { %117 = vmatpush.bf16.msra.mxu0 %v227_v3 }
  0x1c   :  { %118 = vmatpush.bf16.msra.mxu0 %v226_v4 }
  0x20   :  { %119 = vmatpush.bf16.msra.mxu0 %v225_v5 }
  0x24   :  { %120 = vmatpush.bf16.msra.mxu0 %v224_v6 }
  0x28   :  { %121 = vmatpush.bf16.msra.mxu0 %v223_v7 }
  0x2b   :  { %122 = vmatmul.bf16.vlgmr.msra.gmra.mxu0 %v45_v8 }
  0xa8   :  { %v123_v10 = vpop.f32.mrf.mxu0 }
  0xa9   :  { %v124_v11 = vadd.f32 %v236_v9, %v123_v10 }
  0xab   :  { %v128_v12 = vmul.f32 0.70710677, %v124_v11  ;;  %v127_v49 = vmul.f32 0.5, %v124_v11 }
  0xad   :  { %v129_v13 = vmul.f32 %v128_v12, %v128_v12 }
  0xaf   :  { %v130_v14 = vmin.f32 %v129_v13, 16.0 }
  0xb0   :  { %v125_v15 = vpop.f32.mrf.mxu0 }
  0xb1   :  { %v131_v16 = vmul.f32 2.1237322e-06, %v130_v14  ;;  %v142_v17 = vmul.f32 3.8918573e-05, %v130_v14 }
  0xb3   :  { %v132_v18 = vadd.f32 0.00028619796, %v131_v16  ;;  %v143_v19 = vadd.f32 0.001143296, %v142_v17 }
  0xb5   :  { %v133_v20 = vmul.f32 %v132_v18, %v130_v14  ;;  %v144_v21 = vmul.f32 %v143_v19, %v130_v14 }
  0xb7   :  { %v145_v22 = vadd.f32 0.014752088, %v144_v21  ;;  %v134_v23 = vadd.f32 0.0036580483, %v133_v20 }
  0xb9   :  { %v146_v24 = vmul.f32 %v145_v22, %v130_v14  ;;  %v135_v26 = vmul.f32 %v134_v23, %v130_v14 }
  0xbb   :  { %v147_v25 = vadd.f32 0.112945676, %v146_v24  ;;  %v136_v29 = vadd.f32 0.05243302, %v135_v26 }
  0xbd   :  { %v148_v27 = vmul.f32 %v147_v25, %v130_v14  ;;  %v137_v32 = vmul.f32 %v136_v29, %v130_v14 }
  0xbf   :  { %v149_v28 = vadd.f32 0.4994258, %v148_v27  ;;  %v138_v33 = vadd.f32 0.18741608, %v137_v32 }
  0xc1   :  { %v150_v30 = vmul.f32 %v149_v28, %v130_v14  ;;  %v139_v35 = vmul.f32 %v138_v33, %v130_v14 }
  0xc3   :  { %v151_v31 = vadd.f32 1.0, %v150_v30  ;;  %v140_v39 = vadd.f32 1.1283791, %v139_v35 }
  0xc5   :  { %237 = vrcp.f32 %v151_v31  ;;  %v163_v38 = vand.u32 2147483648, %v151_v31  ;;  %v161_v41 = vand.u32 2147483647, %v151_v31  ;;  %vm157_vm1 = vweird.f32 %v151_v31 }
  0xc6   :  { %v141_v44 = vmul.f32 %v140_v39, %v128_v12 }
  0xc7   :  { %v164_v43 = vor.u32 1.1754944e-38, %v163_v38  ;;  %vm162_vm3 = vcmp.eq.f32.partialorder %v161_v41, 8.507059e+37 }
  0xcb   :  { %v238_v34 = vpop.eup %237 }
  0xcc   :  { %v153_v36 = vmul.f32 %v238_v34, %v151_v31  ;;  %vm158_vm0 = vweird.f32 %v238_v34 }
  0xcd   :  { %vm159_vm2 = vmor %vm157_vm1, %vm158_vm0 }
  0xce   :  { %v154_v37 = vsub.f32 1.0, %v153_v36 }
  0xd0   :  { %v155_v40 = vmul.f32 %v238_v34, %v154_v37 }
  0xd2   :  { %v156_v42 = vadd.f32 %v238_v34, %v155_v40 }
  0xd4   :  { %v160_v45 = vsel %vm159_vm2, %v238_v34, %v156_v42 }
  0xd5   :  { %v165_v46 = vsel %vm162_vm3, %v164_v43, %v160_v45 }
  0xd6   :  { %v166_v47 = vmul.f32 %v165_v46, %v141_v44 }
  0xd8   :  { %v222_v48 = vclamps-f32 %v166_v47, 1.0 }
  0xda   :  { %v169_v50 = vadd.f32 1.0, %v222_v48 }
  0xdc   :  { %v170_v51 = vmul.f32 %v169_v50, %v127_v49 }
  0xde   :  { %171 = vst [vmem:[#allocation7] sm:$0xff] %v170_v51 }
  0xdf   :  { %182 = dma.vmem_to_hbm [thread:$0]  %s178_s24, 128, %s180_s27, [#allocation4]  }
  0xe0   :  { %315 = dma.done.wait [#allocation4], 128  }
  0xe1   :  { %316 = vsyncadd [#allocation4], 4294967168 }
  0xe2   :  { %187 = vsyncpa [#allocation3], 1 }
  0xe3   :  { %188 = vsyncpa [#allocation6], 1 }
  0xe4   :  { %189 = vsyncpa [#allocation4], 1 }

</bundles_post_ra>
